<compile_context>
chip_gen: v5e
topology: v5e:2x2
jax: 0.10.0
libtpu: 0.0.40
codegen_flags: <defaults>
</compile_context>

<pallas_src>
import functools

import jax
import jax.numpy as jnp
from jax.experimental import pallas as pl
from jax.experimental.pallas import tpu as pltpu

LANES = 128            # lane width of a vreg; all feature dims are padded to this
SUBLANES = 8           # f32/bf16 sublane quantum; batch padded to a multiple of this
MAX_BATCH_TILE = 2048  # rows per grid step; ~3 MB of activation tiles double-buffered,
                       # comfortably inside v7x's 64 MiB (and v5e/v6e's 128 MiB) VMEM

# Column layout of the packed (128, 768) weight slab / (1, 768) bias slab:
#   [   0:128)  up1
#   [ 128:256)  up2
#   [ 256:512)  fused stage: [ up3 (256:384) | up3∘down1 folded (384:512) ]
#   [ 512:640)  down2
#   [ 640:768)  down3
_SLAB_W = 768


def bnorm_ae_kernel(x_ref, w_ref, b_ref, y_ref, lat_ref):
    """Full forward pass for one batch tile.

    x_ref:   (Bt, 128)    padded input activations, bf16
    w_ref:   (128, 768)   packed bf16 weights (VMEM-resident across the grid)
    b_ref:   (1, 768)     packed f32 biases   (VMEM-resident across the grid)
    y_ref:   (Bt, 128)    padded reconstruction, f32
    lat_ref: (Bt, 128)    padded latent (output of up3), f32
    """

    def lin(h, col, width):
        # bf16 x bf16 MXU matmul with f32 accumulation; bias-add in f32 on the VPU.
        w = w_ref[:, col:col + width]
        b = b_ref[:, col:col + width]
        return jnp.dot(h.astype(jnp.bfloat16), w,
                       preferred_element_type=jnp.float32) + b

    h = x_ref[...]                                    # (Bt, 128) bf16
    h = jnp.maximum(lin(h, 0, 128), 0.0)              # up1 + relu          (f32)
    h = jnp.maximum(lin(h, 128, 128), 0.0)            # up2 + relu

    # Single 256-lane MXU pass computing up3 and the folded up3∘down1 together.
    fused = lin(h, 256, 256)                          # (Bt, 256) f32
    lat_ref[...] = fused[:, :LANES]                   # up3 -> latent output
    h = jnp.maximum(fused[:, LANES:], 0.0)            # relu(lat @ W4 + b4), folded

    h = jnp.maximum(lin(h, 512, 128), 0.0)            # down2 + relu
    y_ref[...] = lin(h, 640, 128)                     # down3 -> reconstruction


def pack_params(params):
    """One-time packing: fold up3->down1, pad to lanes, pack into two slabs.

    Returns (w_slab bf16 (128, 768), b_slab f32 (1, 768)).  Call once at model-load
    time and reuse the slabs across forward calls (they are constant HBM buffers).
    """
    (w1, b1), (w2, b2), (w3, b3), (w4, b4), (w5, b5), (w6, b6) = [
        (jnp.asarray(w, jnp.float32), jnp.asarray(b, jnp.float32)) for (w, b) in params
    ]
    w34 = w3 @ w4              # fold: (in2, latent) @ (latent, out4) -> (in2, out4)
    b34 = b3 @ w4 + b4

    entries = [(0, w1, b1), (128, w2, b2), (256, w3, b3), (384, w34, b34),
               (512, w5, b5), (640, w6, b6)]
    w_slab = jnp.zeros((LANES, _SLAB_W), jnp.float32)
    b_slab = jnp.zeros((1, _SLAB_W), jnp.float32)
    for col, w, b in entries:
        fi, fo = w.shape
        assert fi <= LANES and fo <= LANES, "feature dims must fit one lane tile"
        w_slab = w_slab.at[:fi, col:col + fo].set(w)
        b_slab = b_slab.at[0, col:col + fo].set(b)
    # TODO(synk): optionally shrink the contraction dim of the slab from 128 to the
    # next multiple of 8 >= max fan_in (48 here) to cut weight DMA further on v5e.
    return w_slab.astype(jnp.bfloat16), b_slab


@functools.partial(jax.jit, static_argnames=("latent_dim",))
def bnorm_ae_forward(x, w_slab, b_slab, *, latent_dim):
    """x: (batch, ch) f32.  Returns (reconstruction (batch, ch), latent (batch, latent_dim))."""
    batch, ch = x.shape
    assert ch <= LANES and latent_dim <= LANES, "feature dims must fit one lane tile"

    # Batch tile: at least one sublane-aligned block, capped for VMEM (v7x-safe).
    bt = min(MAX_BATCH_TILE, max(SUBLANES, -(-batch // SUBLANES) * SUBLANES))
    b_pad = -(-batch // bt) * bt
    n_tiles = b_pad // bt

    x_pad = jnp.zeros((b_pad, LANES), jnp.bfloat16).at[:batch, :ch].set(
        x.astype(jnp.bfloat16))

    grid_spec = pltpu.PrefetchScalarGridSpec(
        num_scalar_prefetch=0,
        grid=(n_tiles,),
        in_specs=[
            pl.BlockSpec((bt, LANES), lambda i: (i, 0)),          # activations, tiled
            pl.BlockSpec((LANES, _SLAB_W), lambda i: (0, 0)),     # weights, resident
            pl.BlockSpec((1, _SLAB_W), lambda i: (0, 0)),         # biases, resident
        ],
        out_specs=(
            pl.BlockSpec((bt, LANES), lambda i: (i, 0)),          # reconstruction
            pl.BlockSpec((bt, LANES), lambda i: (i, 0)),          # latent
        ),
    )

    y_pad, lat_pad = pl.pallas_call(
        bnorm_ae_kernel,
        grid_spec=grid_spec,
        out_shape=(jax.ShapeDtypeStruct((b_pad, LANES), jnp.float32),
                   jax.ShapeDtypeStruct((b_pad, LANES), jnp.float32)),
        compiler_params=pltpu.CompilerParams(
            dimension_semantics=("parallel",)),                   # v7x megacore
    )(x_pad, w_slab, b_slab)

    return y_pad[:batch, :ch], lat_pad[:batch, :latent_dim]


def init_params(key, ch_count, increase_dims):
    """Deterministic init mimicking nn.Linear default (uniform +/- 1/sqrt(fan_in))."""
    dims = [
        (ch_count, ch_count + increase_dims // 3),                            # up1
        (ch_count + increase_dims // 3, ch_count + 2 * increase_dims // 3),   # up2
        (ch_count + 2 * increase_dims // 3, ch_count + increase_dims),        # up3
        (ch_count + increase_dims, ch_count + 2 * increase_dims // 3),        # down1
        (ch_count + 2 * increase_dims // 3, ch_count + increase_dims // 3),   # down2
        (ch_count + increase_dims // 3, ch_count),                            # down3
    ]
    params = []
    for (fan_in, fan_out) in dims:
        key, kw, kb = jax.random.split(key, 3)
        bound = 1.0 / jnp.sqrt(jnp.float32(fan_in))
        w = jax.random.uniform(kw, (fan_in, fan_out), jnp.float32, -bound, bound)
        b = jax.random.uniform(kb, (fan_out,), jnp.float32, -bound, bound)
        params.append((w, b))
    return params


def reference_forward(x, params):
    def lin(h, w, b):
        return h @ w + b
    h = jax.nn.relu(lin(x, *params[0]))
    h = jax.nn.relu(lin(h, *params[1]))
    lat = lin(h, *params[2])
    h = jax.nn.relu(lin(lat, *params[3]))
    h = jax.nn.relu(lin(h, *params[4]))
    y = lin(h, *params[5])
    return y, lat


if __name__ == "__main__":
    ch_count = 16
    increase_dims = 24   # dims: 16 -> 24 -> 32 -> 40 -> 32 -> 24 -> 16
    batch = 2

    key = jax.random.PRNGKey(0)
    key, kx = jax.random.split(key)
    x = jax.random.normal(kx, (batch, ch_count), jnp.float32)
    params = init_params(key, ch_count, increase_dims)
    latent_dim = params[2][0].shape[1]

    # Pack once at model-load time; slabs are constant device buffers across calls.
    w_slab, b_slab = pack_params(params)
    jax.block_until_ready((w_slab, b_slab))

    y, lat = bnorm_ae_forward(x, w_slab, b_slab, latent_dim=latent_dim)
    jax.block_until_ready((y, lat))

    y_ref, lat_ref = reference_forward(x, params)
    assert y.shape == (batch, ch_count)
    assert lat.shape == (batch, latent_dim)
    # bf16 weights/activation operands + W3@W4 fold change rounding; bf16-level tolerance.
    assert jnp.allclose(lat, lat_ref, atol=3e-2, rtol=3e-2)
    assert jnp.allclose(y, y_ref, atol=3e-2, rtol=3e-2)

    print("KERNEL_OK")
</pallas_src>

<mosaic_0001>
module attributes {stable_mosaic.version = 11 : i64} {
  func.func @bnorm_ae_kernel(%arg0: i32, %arg1: memref<8x128xbf16, #tpu.memory_space<vmem>>, %arg2: memref<128x768xbf16, #tpu.memory_space<vmem>>, %arg3: memref<1x768xf32, #tpu.memory_space<vmem>>, %arg4: memref<8x128xf32, #tpu.memory_space<vmem>>, %arg5: memref<8x128xf32, #tpu.memory_space<vmem>>) attributes {dimension_semantics = [#tpu.dimension_semantics<parallel>], iteration_bounds = array<i64: 1>, scalar_prefetch = 0 : i64, scratch_operands = 0 : i64, tpu.core_type = #tpu.core_type<tc>, window_params = [{transform_indices = @transform_0, window_bounds = array<i64: 8, 128>}, {pipeline_mode = #tpu.pipeline_mode<synchronous>, transform_indices = @transform_1, window_bounds = array<i64: 128, 768>}, {pipeline_mode = #tpu.pipeline_mode<synchronous>, transform_indices = @transform_2, window_bounds = array<i64: 1, 768>}, {transform_indices = @transform_3, window_bounds = array<i64: 8, 128>}, {transform_indices = @transform_4, window_bounds = array<i64: 8, 128>}]} {
    %c0 = arith.constant 0 : index
    %c0_0 = arith.constant 0 : index
    %0 = vector.load %arg1[%c0, %c0_0] : memref<8x128xbf16, #tpu.memory_space<vmem>>, vector<8x128xbf16>
    %c0_1 = arith.constant 0 : index
    %c0_2 = arith.constant 0 : index
    %1 = vector.load %arg2[%c0_1, %c0_2] : memref<128x768xbf16, #tpu.memory_space<vmem>>, vector<128x128xbf16>
    %c0_3 = arith.constant 0 : index
    %c0_4 = arith.constant 0 : index
    %2 = vector.load %arg3[%c0_3, %c0_4] : memref<1x768xf32, #tpu.memory_space<vmem>>, vector<1x128xf32>
    %cst = arith.constant dense<0.000000e+00> : vector<8x128xf32>
    %3 = tpu.matmul %0, %1, %cst {dimension_numbers = #tpu.dot_dimension_numbers<[1], [0], [0], [1], [0, 0, 1, 1], [], []>} : vector<8x128xbf16>, vector<128x128xbf16>, vector<8x128xf32> -> vector<8x128xf32>
    %4 = vector.broadcast %2 : vector<1x128xf32> to vector<8x128xf32>
    %5 = arith.addf %3, %4 : vector<8x128xf32>
    %cst_5 = arith.constant 0.000000e+00 : f32
    %6 = vector.broadcast %cst_5 : f32 to vector<8x128xf32>
    %7 = arith.maximumf %5, %6 : vector<8x128xf32>
    %c0_6 = arith.constant 0 : index
    %c128 = arith.constant 128 : index
    %8 = vector.load %arg2[%c0_6, %c128] : memref<128x768xbf16, #tpu.memory_space<vmem>>, vector<128x128xbf16>
    %c0_7 = arith.constant 0 : index
    %c128_8 = arith.constant 128 : index
    %9 = vector.load %arg3[%c0_7, %c128_8] : memref<1x768xf32, #tpu.memory_space<vmem>>, vector<1x128xf32>
    %10 = arith.truncf %7 : vector<8x128xf32> to vector<8x128xbf16>
    %cst_9 = arith.constant dense<0.000000e+00> : vector<8x128xf32>
    %11 = tpu.matmul %10, %8, %cst_9 {dimension_numbers = #tpu.dot_dimension_numbers<[1], [0], [0], [1], [0, 0, 1, 1], [], []>} : vector<8x128xbf16>, vector<128x128xbf16>, vector<8x128xf32> -> vector<8x128xf32>
    %12 = vector.broadcast %9 : vector<1x128xf32> to vector<8x128xf32>
    %13 = arith.addf %11, %12 : vector<8x128xf32>
    %cst_10 = arith.constant 0.000000e+00 : f32
    %14 = vector.broadcast %cst_10 : f32 to vector<8x128xf32>
    %15 = arith.maximumf %13, %14 : vector<8x128xf32>
    %c0_11 = arith.constant 0 : index
    %c256 = arith.constant 256 : index
    %16 = vector.load %arg2[%c0_11, %c256] : memref<128x768xbf16, #tpu.memory_space<vmem>>, vector<128x256xbf16>
    %c0_12 = arith.constant 0 : index
    %c256_13 = arith.constant 256 : index
    %17 = vector.load %arg3[%c0_12, %c256_13] : memref<1x768xf32, #tpu.memory_space<vmem>>, vector<1x256xf32>
    %18 = arith.truncf %15 : vector<8x128xf32> to vector<8x128xbf16>
    %cst_14 = arith.constant dense<0.000000e+00> : vector<8x256xf32>
    %19 = tpu.matmul %18, %16, %cst_14 {dimension_numbers = #tpu.dot_dimension_numbers<[1], [0], [0], [1], [0, 0, 1, 1], [], []>} : vector<8x128xbf16>, vector<128x256xbf16>, vector<8x256xf32> -> vector<8x256xf32>
    %20 = vector.broadcast %17 : vector<1x256xf32> to vector<8x256xf32>
    %21 = arith.addf %19, %20 : vector<8x256xf32>
    %22 = vector.extract_strided_slice %21 {offsets = [0, 0], sizes = [8, 128], strides = [1, 1]} : vector<8x256xf32> to vector<8x128xf32>
    %c0_15 = arith.constant 0 : index
    %c0_16 = arith.constant 0 : index
    %23 = vector.load %arg5[%c0_15, %c0_16] : memref<8x128xf32, #tpu.memory_space<vmem>>, vector<8x128xf32>
    tpu.vector_store %arg5[%c0_15, %c0_16], %22 {strides = array<i32>} : memref<8x128xf32, #tpu.memory_space<vmem>>, vector<8x128xf32>,
    %24 = vector.extract_strided_slice %21 {offsets = [0, 128], sizes = [8, 128], strides = [1, 1]} : vector<8x256xf32> to vector<8x128xf32>
    %cst_17 = arith.constant 0.000000e+00 : f32
    %25 = vector.broadcast %cst_17 : f32 to vector<8x128xf32>
    %26 = arith.maximumf %24, %25 : vector<8x128xf32>
    %c0_18 = arith.constant 0 : index
    %c512 = arith.constant 512 : index
    %27 = vector.load %arg2[%c0_18, %c512] : memref<128x768xbf16, #tpu.memory_space<vmem>>, vector<128x128xbf16>
    %c0_19 = arith.constant 0 : index
    %c512_20 = arith.constant 512 : index
    %28 = vector.load %arg3[%c0_19, %c512_20] : memref<1x768xf32, #tpu.memory_space<vmem>>, vector<1x128xf32>
    %29 = arith.truncf %26 : vector<8x128xf32> to vector<8x128xbf16>
    %cst_21 = arith.constant dense<0.000000e+00> : vector<8x128xf32>
    %30 = tpu.matmul %29, %27, %cst_21 {dimension_numbers = #tpu.dot_dimension_numbers<[1], [0], [0], [1], [0, 0, 1, 1], [], []>} : vector<8x128xbf16>, vector<128x128xbf16>, vector<8x128xf32> -> vector<8x128xf32>
    %31 = vector.broadcast %28 : vector<1x128xf32> to vector<8x128xf32>
    %32 = arith.addf %30, %31 : vector<8x128xf32>
    %cst_22 = arith.constant 0.000000e+00 : f32
    %33 = vector.broadcast %cst_22 : f32 to vector<8x128xf32>
    %34 = arith.maximumf %32, %33 : vector<8x128xf32>
    %c0_23 = arith.constant 0 : index
    %c640 = arith.constant 640 : index
    %35 = vector.load %arg2[%c0_23, %c640] : memref<128x768xbf16, #tpu.memory_space<vmem>>, vector<128x128xbf16>
    %c0_24 = arith.constant 0 : index
    %c640_25 = arith.constant 640 : index
    %36 = vector.load %arg3[%c0_24, %c640_25] : memref<1x768xf32, #tpu.memory_space<vmem>>, vector<1x128xf32>
    %37 = arith.truncf %34 : vector<8x128xf32> to vector<8x128xbf16>
    %cst_26 = arith.constant dense<0.000000e+00> : vector<8x128xf32>
    %38 = tpu.matmul %37, %35, %cst_26 {dimension_numbers = #tpu.dot_dimension_numbers<[1], [0], [0], [1], [0, 0, 1, 1], [], []>} : vector<8x128xbf16>, vector<128x128xbf16>, vector<8x128xf32> -> vector<8x128xf32>
    %39 = vector.broadcast %36 : vector<1x128xf32> to vector<8x128xf32>
    %40 = arith.addf %38, %39 : vector<8x128xf32>
    %c0_27 = arith.constant 0 : index
    %c0_28 = arith.constant 0 : index
    %41 = vector.load %arg4[%c0_27, %c0_28] : memref<8x128xf32, #tpu.memory_space<vmem>>, vector<8x128xf32>
    tpu.vector_store %arg4[%c0_27, %c0_28], %40 {strides = array<i32>} : memref<8x128xf32, #tpu.memory_space<vmem>>, vector<8x128xf32>,
    return
  }
  func.func @transform_0(%arg0: i32) -> (i32, i32) {
    %c0_i32 = arith.constant 0 : i32
    %c0_i32_0 = arith.constant 0 : i32
    return %arg0, %c0_i32 : i32, i32
  }
  func.func @transform_1(%arg0: i32) -> (i32, i32) {
    %c0_i32 = arith.constant 0 : i32
    %c0_i32_0 = arith.constant 0 : i32
    %c0_i32_1 = arith.constant 0 : i32
    return %c0_i32, %c0_i32_0 : i32, i32
  }
  func.func @transform_2(%arg0: i32) -> (i32, i32) {
    %c0_i32 = arith.constant 0 : i32
    %c0_i32_0 = arith.constant 0 : i32
    %c0_i32_1 = arith.constant 0 : i32
    return %c0_i32, %c0_i32_0 : i32, i32
  }
  func.func @transform_3(%arg0: i32) -> (i32, i32) {
    %c0_i32 = arith.constant 0 : i32
    %c0_i32_0 = arith.constant 0 : i32
    return %arg0, %c0_i32 : i32, i32
  }
  func.func @transform_4(%arg0: i32) -> (i32, i32) {
    %c0_i32 = arith.constant 0 : i32
    %c0_i32_0 = arith.constant 0 : i32
    return %arg0, %c0_i32 : i32, i32
  }
}

</mosaic_0001>

<bundles_post_ra>
// kernel: bnorm_ae_forward.1
= control target key start
LH: loop header
LB: loop body
LE: loop exit
PB: predicated region body
PF: predicated region fallthrough
CT: control target
= control target key end

     0   :  { %10 = vsyncpa [#allocation3], 0  ;;  %s777_s18 = smov [#allocation2]   ;;  %s778_s20 = smov 384   ;;  %s832_s0 = inlined_call_operand.vmem [shape: bf16[8,128], index: 0, kind: input, shape index: {}]   ;;  %s833_s1 = inlined_call_operand.hbm [shape: bf16[128,768], index: 1, kind: input, shape index: {}]   ;;  %s834_s2 = inlined_call_operand.vmem [shape: f32[1,768], index: 2, kind: input, shape index: {}]   ;;  %s835_s3 = inlined_call_operand.vmem [shape: f32[8,128], index: 3, kind: output, shape index: {0}]   ;;  %s836_s4 = inlined_call_operand.vmem [shape: f32[8,128], index: 4, kind: output, shape index: {1}]  }
   0x1   :  { %s17_s17 = sshll.u32 %s833_s1, 4  ;;  %s19_s19 = sshll.u32 %s777_s18, 4  ;;  %s18_s17 = int_to_ptr.hbm [resolvable:$true] %s17_s17  ;;  %s20_s19 = int_to_ptr.vmem [resolvable:$true] %s19_s19 }
   0x2   :  { %s779_s21 = smov 24  }
   0x3   :  { %25 = dma.hbm_to_vmem [thread:$0]  %s18_s17, 6144, %s20_s19, [#allocation3], %s778_s20, %s778_s20, %s779_s21  }
   0x4   :  { %775 = dma.done.wait [#allocation3], 6144  }
   0x5   :  { %776 = vsyncadd [#allocation3], 4294961152  ;;  %v534_v0 = vld [vmem:[#allocation2 + $0x150] sm:$0xf]  ;;  %v703_v1 = vld [vmem:[#allocation2 + $0x164] sm:$0xf0] }
   0x6   :  { %v530_v2 = vld [vmem:[#allocation2 + $0x120] sm:$0xf]  ;;  %v535_v3 = vor.u32 %v703_v1, %v534_v0  ;;  %v702_v4 = vld [vmem:[#allocation2 + $0x134] sm:$0xf0]  ;;  %v526_v6 = vld [vmem:[#allocation2 + $0xf0] sm:$0xf] }
   0x7   :  { %v531_v5 = vor.u32 %v702_v4, %v530_v2  ;;  %v701_v7 = vld [vmem:[#allocation2 + $0x104] sm:$0xf0]  ;;  %v566_v8 = vld [vmem:[#allocation2 + $0x154] sm:$0xf]  ;;  %v711_v9 = vld [vmem:[#allocation2 + $0x168] sm:$0xf0] }
   0x8   :  { %101 = vmatpush.bf16.msra.mxu0 %v535_v3  ;;  %v562_v10 = vld [vmem:[#allocation2 + $0x124] sm:$0xf]  ;;  %v710_v11 = vld [vmem:[#allocation2 + $0x138] sm:$0xf0]  ;;  %v527_v12 = vor.u32 %v701_v7, %v526_v6  ;;  %v567_v13 = vor.u32 %v711_v9, %v566_v8  ;;  %v522_v14 = vld [vmem:[#allocation2 + $0xc0] sm:$0xf] }
   0x9   :  { %v700_v15 = vld [vmem:[#allocation2 + $0xd4] sm:$0xf0]  ;;  %v563_v16 = vor.u32 %v710_v11, %v562_v10  ;;  %v558_v17 = vld [vmem:[#allocation2 + $0xf4] sm:$0xf]  ;;  %v709_v18 = vld [vmem:[#allocation2 + $0x108] sm:$0xf0] }
   0xa   :  { %184 = vmatpush.bf16.msra.mxu1 %v567_v13  ;;  %v523_v19 = vor.u32 %v700_v15, %v522_v14  ;;  %v518_v20 = vld [vmem:[#allocation2 + $0x90] sm:$0xf]  ;;  %v699_v21 = vld [vmem:[#allocation2 + $0xa4] sm:$0xf0]  ;;  %v559_v22 = vor.u32 %v709_v18, %v558_v17  ;;  %v554_v23 = vld [vmem:[#allocation2 + $0xc4] sm:$0xf] }
   0xb   :  { %v708_v24 = vld [vmem:[#allocation2 + $0xd8] sm:$0xf0]  ;;  %v519_v25 = vor.u32 %v699_v21, %v518_v20  ;;  %v514_v26 = vld [vmem:[#allocation2 + $0x60] sm:$0xf]  ;;  %v698_v27 = vld [vmem:[#allocation2 + $0x74] sm:$0xf0] }
   0xc   :  { %102 = vmatpush.bf16.msra.mxu0 %v531_v5  ;;  %v555_v28 = vor.u32 %v708_v24, %v554_v23  ;;  %v550_v29 = vld [vmem:[#allocation2 + $0x94] sm:$0xf]  ;;  %v707_v30 = vld [vmem:[#allocation2 + $0xa8] sm:$0xf0]  ;;  %v515_v31 = vor.u32 %v698_v27, %v514_v26  ;;  %v510_v32 = vld [vmem:[#allocation2 + $0x30] sm:$0xf] }
   0xd   :  { %v697_v33 = vld [vmem:[#allocation2 + $0x44] sm:$0xf0]  ;;  %v551_v34 = vor.u32 %v707_v30, %v550_v29  ;;  %v546_v35 = vld [vmem:[#allocation2 + $0x64] sm:$0xf]  ;;  %v706_v36 = vld [vmem:[#allocation2 + $0x78] sm:$0xf0] }
   0xe   :  { %185 = vmatpush.bf16.msra.mxu1 %v563_v16  ;;  %v511_v37 = vor.u32 %v697_v33, %v510_v32  ;;  %v506_v38 = vld [vmem:[#allocation2] sm:$0xf]  ;;  %v696_v39 = vld [vmem:[#allocation2 + $0x14] sm:$0xf0]  ;;  %v547_v40 = vor.u32 %v706_v36, %v546_v35  ;;  %v542_v43 = vld [vmem:[#allocation2 + $0x34] sm:$0xf] }
   0xf   :  { %v507_v41 = vor.u32 %v696_v39, %v506_v38  ;;  %v32_v42 = vld [vmem:[%s832_s0] sm:$0xf]  ;;  %v705_v44 = vld [vmem:[#allocation2 + $0x48] sm:$0xf0]  ;;  %v538_v46 = vld [vmem:[#allocation2 + $0x4] sm:$0xf] }
  0x10   :  { %103 = vmatpush.bf16.msra.mxu0 %v527_v12  ;;  %v543_v45 = vor.u32 %v705_v44, %v542_v43  ;;  %v704_v47 = vld [vmem:[#allocation2 + $0x18] sm:$0xf0]  ;;  %v626_v49 = vld [vmem:[#allocation2 + $0x158] sm:$0xf]  ;;  %v727_v50 = vld [vmem:[#allocation2 + $0x16c] sm:$0xf0] }
  0x11   :  { %v539_v48 = vor.u32 %v704_v47, %v538_v46  ;;  %v726_v51 = vld [vmem:[#allocation2 + $0x15c] sm:$0xf]  ;;  %v627_v52 = vor.u32 %v727_v50, %v626_v49  ;;  %v628_v53 = vld [vmem:[#allocation2 + $0x170] sm:$0xf0]  ;;  %v618_v54 = vld [vmem:[#allocation2 + $0x128] sm:$0xf] }
  0x12   :  { %186 = vmatpush.bf16.msra.mxu1 %v559_v22  ;;  %v725_v55 = vld [vmem:[#allocation2 + $0x13c] sm:$0xf0]  ;;  %v631_v56 = vor.u32 %v726_v51, %v628_v53  ;;  %v724_v57 = vld [vmem:[#allocation2 + $0x12c] sm:$0xf]  ;;  %v620_v58 = vld [vmem:[#allocation2 + $0x140] sm:$0xf0] }
  0x13   :  { %301 = vmatpush.bf16.msra.mxu2 %v627_v52  ;;  %v619_v59 = vor.u32 %v725_v55, %v618_v54  ;;  %v623_v60 = vor.u32 %v724_v57, %v620_v58  ;;  %v610_v61 = vld [vmem:[#allocation2 + $0xf8] sm:$0xf]  ;;  %v723_v62 = vld [vmem:[#allocation2 + $0x10c] sm:$0xf0]  ;;  %v722_v63 = vld [vmem:[#allocation2 + $0xfc] sm:$0xf] }
  0x14   :  { %104 = vmatpush.bf16.msra.mxu0 %v523_v19  ;;  %314 = vmatpush.bf16.msra.mxu3 %v631_v56  ;;  %v612_v0 = vld [vmem:[#allocation2 + $0x110] sm:$0xf0]  ;;  %v611_v1 = vor.u32 %v723_v62, %v610_v61  ;;  %v602_v3 = vld [vmem:[#allocation2 + $0xc8] sm:$0xf]  ;;  %v721_v4 = vld [vmem:[#allocation2 + $0xdc] sm:$0xf0] }
  0x15   :  { %v615_v2 = vor.u32 %v722_v63, %v612_v0  ;;  %v720_v5 = vld [vmem:[#allocation2 + $0xcc] sm:$0xf]  ;;  %v604_v6 = vld [vmem:[#allocation2 + $0xe0] sm:$0xf0]  ;;  %v603_v7 = vor.u32 %v721_v4, %v602_v3  ;;  %v594_v9 = vld [vmem:[#allocation2 + $0x98] sm:$0xf] }
  0x16   :  { %187 = vmatpush.bf16.msra.mxu1 %v555_v28  ;;  %v607_v8 = vor.u32 %v720_v5, %v604_v6  ;;  %v719_v10 = vld [vmem:[#allocation2 + $0xac] sm:$0xf0]  ;;  %v718_v11 = vld [vmem:[#allocation2 + $0x9c] sm:$0xf]  ;;  %v596_v12 = vld [vmem:[#allocation2 + $0xb0] sm:$0xf0] }
  0x17   :  { %302 = vmatpush.bf16.msra.mxu2 %v619_v59  ;;  %v595_v13 = vor.u32 %v719_v10, %v594_v9  ;;  %v599_v14 = vor.u32 %v718_v11, %v596_v12  ;;  %v586_v15 = vld [vmem:[#allocation2 + $0x68] sm:$0xf]  ;;  %v717_v16 = vld [vmem:[#allocation2 + $0x7c] sm:$0xf0]  ;;  %v716_v17 = vld [vmem:[#allocation2 + $0x6c] sm:$0xf] }
  0x18   :  { %105 = vmatpush.bf16.msra.mxu0 %v519_v25  ;;  %315 = vmatpush.bf16.msra.mxu3 %v623_v60  ;;  %v588_v18 = vld [vmem:[#allocation2 + $0x80] sm:$0xf0]  ;;  %v587_v19 = vor.u32 %v717_v16, %v586_v15  ;;  %v747_v21 = vld [vmem:[%s834_s2] ss:$0 sm:$0xff]  ;;  %v578_v27 = vld [vmem:[#allocation2 + $0x38] sm:$0xf] }
  0x19   :  { %v591_v20 = vor.u32 %v716_v17, %v588_v18  ;;  %v715_v28 = vld [vmem:[#allocation2 + $0x4c] sm:$0xf0]  ;;  %v714_v29 = vld [vmem:[#allocation2 + $0x3c] sm:$0xf]  ;;  %v570_v33 = vld [vmem:[#allocation2 + $0x8] sm:$0xf] }
  0x1a   :  { %188 = vmatpush.bf16.msra.mxu1 %v551_v34  ;;  %v579_v30 = vor.u32 %v715_v28, %v578_v27  ;;  %v713_v34 = vld [vmem:[#allocation2 + $0x1c] sm:$0xf0]  ;;  %v712_v35 = vld [vmem:[#allocation2 + $0xc] sm:$0xf]  ;;  %v734_v43 = vld [vmem:[#allocation2 + $0x144] sm:$0xf0] }
  0x1b   :  { %303 = vmatpush.bf16.msra.mxu2 %v611_v1  ;;  %v571_v36 = vor.u32 %v713_v34, %v570_v33  ;;  %v662_v39 = vld [vmem:[#allocation2 + $0x160] sm:$0xf]  ;;  %v733_v46 = vld [vmem:[#allocation2 + $0x114] sm:$0xf0]  ;;  %v732_v49 = vld [vmem:[#allocation2 + $0xe4] sm:$0xf0] }
  0x1c   :  { %106 = vmatpush.bf16.msra.mxu0 %v515_v31  ;;  %316 = vmatpush.bf16.msra.mxu3 %v615_v2  ;;  %v580_v31 = vld [vmem:[#allocation2 + $0x50] sm:$0xf0]  ;;  %v646_v51 = vld [vmem:[#allocation2 + $0xa0] sm:$0xf]  ;;  %v731_v52 = vld [vmem:[#allocation2 + $0xb4] sm:$0xf0] }
  0x1d   :  { %v583_v32 = vor.u32 %v714_v29, %v580_v31  ;;  %v647_v53 = vor.u32 %v731_v52, %v646_v51  ;;  %v642_v54 = vld [vmem:[#allocation2 + $0x70] sm:$0xf]  ;;  %v730_v55 = vld [vmem:[#allocation2 + $0x84] sm:$0xf0]  ;;  %v748_v57 = vld [vmem:[%s834_s2 + $0x1] ss:$0 sm:$0xff] }
  0x1e   :  { %189 = vmatpush.bf16.msra.mxu1 %v547_v40  ;;  %v735_v40 = vld [vmem:[#allocation2 + $0x174] sm:$0xf0]  ;;  %v643_v56 = vor.u32 %v730_v55, %v642_v54  ;;  %v638_v63 = vld [vmem:[#allocation2 + $0x40] sm:$0xf]  ;;  %v634_v2 = vld [vmem:[#allocation2 + $0x10] sm:$0xf] }
  0x1f   :  { %304 = vmatpush.bf16.msra.mxu2 %v603_v7  ;;  %v729_v0 = vld [vmem:[#allocation2 + $0x54] sm:$0xf0]  ;;  %v728_v3 = vld [vmem:[#allocation2 + $0x24] sm:$0xf0]  ;;  %v694_v5 = vld [vmem:[#allocation2 + $0x164] sm:$0xf] }
  0x20   :  { %107 = vmatpush.bf16.msra.mxu0 %v511_v37  ;;  %317 = vmatpush.bf16.msra.mxu3 %v607_v8  ;;  %v572_v37 = vld [vmem:[#allocation2 + $0x20] sm:$0xf0]  ;;  %v639_v1 = vor.u32 %v729_v0, %v638_v63  ;;  %v635_v4 = vor.u32 %v728_v3, %v634_v2  ;;  %v743_v6 = vld [vmem:[#allocation2 + $0x178] sm:$0xf0]  ;;  %v690_v7 = vld [vmem:[#allocation2 + $0x134] sm:$0xf] }
  0x21   :  { %v575_v38 = vor.u32 %v712_v35, %v572_v37  ;;  %v695_v8 = vor.u32 %v743_v6, %v694_v5  ;;  %v742_v9 = vld [vmem:[#allocation2 + $0x148] sm:$0xf0]  ;;  %v686_v11 = vld [vmem:[#allocation2 + $0x104] sm:$0xf]  ;;  %v741_v12 = vld [vmem:[#allocation2 + $0x118] sm:$0xf0] }
  0x22   :  { %190 = vmatpush.bf16.msra.mxu1 %v543_v45  ;;  %v654_v45 = vld [vmem:[#allocation2 + $0x100] sm:$0xf]  ;;  %v691_v10 = vor.u32 %v742_v9, %v690_v7  ;;  %v740_v15 = vld [vmem:[#allocation2 + $0xe8] sm:$0xf0]  ;;  %v678_v17 = vld [vmem:[#allocation2 + $0xa4] sm:$0xf] }
  0x23   :  { %305 = vmatpush.bf16.msra.mxu2 %v595_v13  ;;  %v655_v47 = vor.u32 %v733_v46, %v654_v45  ;;  %v687_v13 = vor.u32 %v741_v12, %v686_v11  ;;  %v739_v18 = vld [vmem:[#allocation2 + $0xb8] sm:$0xf0]  ;;  %v670_v34 = vld [vmem:[#allocation2 + $0x44] sm:$0xf]  ;;  %v666_v37 = vld [vmem:[#allocation2 + $0x14] sm:$0xf] }
  0x24   :  { %108 = vmatpush.bf16.msra.mxu0 %v507_v41  ;;  %318 = vmatpush.bf16.msra.mxu3 %v599_v14  ;;  %v658_v41 = vld [vmem:[#allocation2 + $0x130] sm:$0xf]  ;;  %v682_v14 = vld [vmem:[#allocation2 + $0xd4] sm:$0xf]  ;;  %v737_v35 = vld [vmem:[#allocation2 + $0x58] sm:$0xf0] }
  0x25   :  { %v659_v44 = vor.u32 %v734_v43, %v658_v41  ;;  %v683_v16 = vor.u32 %v740_v15, %v682_v14  ;;  %v750_v46 = vld [vmem:[%s834_s2 + $0x5] ss:$0 sm:$0xff] }
  0x26   :  { %191 = vmatpush.bf16.msra.mxu1 %v539_v48  ;;  %v650_v48 = vld [vmem:[#allocation2 + $0xd0] sm:$0xf] }
  0x27   :  { %109 = vmatmul.bf16.vlgmr.msra.gmra.mxu0 %v32_v42  ;;  %306 = vmatpush.bf16.msra.mxu2 %v587_v19  ;;  %v663_v42 = vor.u32 %v735_v40, %v662_v39  ;;  %v651_v50 = vor.u32 %v732_v49, %v650_v48  ;;  %v679_v19 = vor.u32 %v739_v18, %v678_v17  ;;  %v749_v40 = vld [vmem:[%s834_s2 + $0x4] ss:$0 sm:$0xff] }
  0x28   :  { %319 = vmatpush.bf16.msra.mxu3 %v591_v20  ;;  %v674_v20 = vld [vmem:[#allocation2 + $0x74] sm:$0xf] }
  0x29   :  { %398 = vmatpush.bf16.msrb.mxu0 %v663_v42 }
  0x2a   :  { %481 = vmatpush.bf16.msrb.mxu1 %v695_v8 }
  0x2b   :  { %307 = vmatpush.bf16.msra.mxu2 %v579_v30 }
  0x2c   :  { %320 = vmatpush.bf16.msra.mxu3 %v583_v32 }
  0x2d   :  { %399 = vmatpush.bf16.msrb.mxu0 %v659_v44 }
  0x2e   :  { %482 = vmatpush.bf16.msrb.mxu1 %v691_v10 }
  0x2f   :  { %308 = vmatpush.bf16.msra.mxu2 %v571_v36  ;;  %v671_v36 = vor.u32 %v737_v35, %v670_v34 }
  0x30   :  { %321 = vmatpush.bf16.msra.mxu3 %v575_v38  ;;  %v736_v38 = vld [vmem:[#allocation2 + $0x28] sm:$0xf0] }
  0x31   :  { %400 = vmatpush.bf16.msrb.mxu0 %v655_v47  ;;  %v667_v39 = vor.u32 %v736_v38, %v666_v37 }
  0x32   :  { %483 = vmatpush.bf16.msrb.mxu1 %v687_v13 }
  0x35   :  { %401 = vmatpush.bf16.msrb.mxu0 %v651_v50 }
  0x36   :  { %484 = vmatpush.bf16.msrb.mxu1 %v683_v16 }
  0x39   :  { %402 = vmatpush.bf16.msrb.mxu0 %v647_v53 }
  0x3a   :  { %485 = vmatpush.bf16.msrb.mxu1 %v679_v19 }
  0x3d   :  { %403 = vmatpush.bf16.msrb.mxu0 %v643_v56 }
  0x41   :  { %404 = vmatpush.bf16.msrb.mxu0 %v639_v1 }
  0x45   :  { %405 = vmatpush.bf16.msrb.mxu0 %v635_v4 }
  0xa4   :  { %v110_v22 = vpop.f32.mrf.mxu0 }
  0xa5   :  { %v111_v23 = vadd.f32 %v747_v21, %v110_v22  ;;  %v738_v21 = vld [vmem:[#allocation2 + $0x88] sm:$0xf0]  ;;  %v214_v22 = vld [vmem:[%s834_s2 + $0x2] sm:$0x3] }
  0xa7   :  { %v114_v24 = vmax.f32 %v111_v23, 0.0  ;;  %v675_v23 = vor.u32 %v738_v21, %v674_v20 }
  0xa9   :  { %v132_v25 = vpack.c.bf16 %v114_v24, %v114_v24  ;;  %v217_v24 = vperm.slane %v214_v22, 0  ;;  %486 = vmatpush.bf16.msrb.mxu1 %v675_v23 }
  0xab   :  { %192 = vmatmul.bf16.vlgmr.msra.gmra.mxu1 %v132_v25  ;;  %v218_v25 = vperm.slane %v214_v22, 1 }
  0xac   :  { %v112_v26 = vpop.f32.mrf.mxu0 }
  0xad   :  { %487 = vmatpush.bf16.msrb.mxu1 %v671_v36 }
  0xb1   :  { %488 = vmatpush.bf16.msrb.mxu1 %v667_v39 }
 0x128   :  { %v193_v58 = vpop.f32.mrf.mxu1 }
 0x129   :  { %v194_v59 = vadd.f32 %v748_v57, %v193_v58 }
 0x12b   :  { %v197_v60 = vmax.f32 %v194_v59, 0.0 }
 0x12d   :  { %v215_v61 = vpack.c.bf16 %v197_v60, %v197_v60 }
 0x12f   :  { %309 = vmatmul.bf16.vlgmr.msra.gmra.mxu2 %v215_v61  ;;  %322 = vmatmul.bf16.vlgmr.msra.gmra.mxu3 %v215_v61 }
 0x130   :  { %v195_v62 = vpop.f32.mrf.mxu1 }
 0x1b2   :  { %v310_v26 = vpop.f32.mrf.mxu2  ;;  %v323_v27 = vpop.f32.mrf.mxu3 }
 0x1b3   :  { %v311_v28 = vadd.f32 %v310_v26, %v217_v24  ;;  %v324_v29 = vadd.f32 %v323_v27, %v218_v25 }
 0x1b5   :  { %327 = vst [vmem:[%s836_s4] sm:$0xff] %v311_v28  ;;  %v328_v30 = vmax.f32 %v324_v29, 0.0 }
 0x1b7   :  { %v346_v31 = vpack.c.bf16 %v328_v30, %v328_v30 }
 0x1b9   :  { %406 = vmatmul.bf16.vlgmr.msrb.gmra.mxu0 %v346_v31 }
 0x1ba   :  { %v312_v32 = vpop.f32.mrf.mxu2  ;;  %v325_v33 = vpop.f32.mrf.mxu3 }
 0x236   :  { %v407_v41 = vpop.f32.mrf.mxu0 }
 0x237   :  { %v408_v42 = vadd.f32 %v749_v40, %v407_v41 }
 0x239   :  { %v411_v43 = vmax.f32 %v408_v42, 0.0 }
 0x23b   :  { %v429_v44 = vpack.c.bf16 %v411_v43, %v411_v43 }
 0x23d   :  { %489 = vmatmul.bf16.vlgmr.msrb.gmra.mxu1 %v429_v44 }
 0x23e   :  { %v409_v45 = vpop.f32.mrf.mxu0 }
 0x2ba   :  { %v490_v47 = vpop.f32.mrf.mxu1 }
 0x2bb   :  { %v491_v48 = vadd.f32 %v750_v46, %v490_v47 }
 0x2bd   :  { %494 = vst [vmem:[%s835_s3] sm:$0xff] %v491_v48 }
 0x2c2   :  { %v492_v49 = vpop.f32.mrf.mxu1 }
 0x2c3   :  { %503 = vsyncpa [#allocation3], 1 }

</bundles_post_ra>
